<compile_context>
chip_gen: v5e
topology: v5e:2x2
jax: 0.10.0
libtpu: 0.0.40
codegen_flags: <defaults>
</compile_context>

<pallas_src>
import jax
import jax.numpy as jnp
from jax.experimental import pallas as pl
from jax.experimental.pallas import tpu as pltpu


def _round_up(v, m):
    return ((v + m - 1) // m) * m


def _predictor_kernel(x_ref, w_ref, b_ref, out_ref):
    # One wide MXU matmul per N-tile; f32 accumulate; lane-dense store.
    acc = jnp.dot(x_ref[...], w_ref[...], preferred_element_type=jnp.float32)
    out_ref[...] = (acc + b_ref[...]).astype(out_ref.dtype)


def prepare_params(params, *, compute_dtype=jnp.bfloat16):
    """One-time fold of the three heads into a single fused, padded weight.

    Done once per parameter set (NOT per forward call).  The fold itself is
    f32 with precision=HIGHEST; only the final fused weight is cast to
    `compute_dtype`.  Bias stays f32 (added after the f32 accumulation).
    """
    f32 = jnp.float32
    wc, bc = params["wc"].astype(f32), params["bc"].astype(f32)
    wb, bb = params["wb"].astype(f32), params["bb"].astype(f32)
    wd, bd = params["wd"].astype(f32), params["bd"].astype(f32)
    c, num_classes = wc.shape

    hi = jax.lax.Precision.HIGHEST
    wd_s = wd[:num_classes, :]            # multiplies scores
    wd_x = wd[num_classes:, :]            # multiplies x
    wd_eff = wd_x + jnp.dot(wc, wd_s, precision=hi)
    bd_eff = bd + jnp.dot(bc, wd_s, precision=hi)

    w_all = jnp.concatenate([wc, wb, wd_eff], axis=1)     # (C, 9K)
    b_all = jnp.concatenate([bc, bb, bd_eff], axis=0)     # (9K,)
    out_dim = w_all.shape[1]

    c_pad = _round_up(c, 128)
    out_pad = _round_up(out_dim, 128)
    w_p = jnp.pad(w_all, ((0, c_pad - c), (0, out_pad - out_dim))).astype(compute_dtype)
    b_p = jnp.pad(b_all, (0, out_pad - out_dim)).reshape(1, -1)   # stays f32

    return {
        "w": w_p, "b": b_p,
        "in_channels": c, "num_classes": num_classes,
        "out_dim": out_dim, "c_pad": c_pad, "out_pad": out_pad,
    }


def _resident_specs(w_shape, b_shape):
    """Constant-index (VMEM-resident) specs; single-buffered when supported."""
    idx = lambda i: (0, 0)
    try:
        mode = pl.Buffered(1)   # constant index_map => one buffer is enough
        return (pl.BlockSpec(w_shape, idx, pipeline_mode=mode),
                pl.BlockSpec(b_shape, idx, pipeline_mode=mode),
                1)
    except (AttributeError, TypeError):
        return pl.BlockSpec(w_shape, idx), pl.BlockSpec(b_shape, idx), 2


def _vmem_ceiling():
    try:
        cap = int(pltpu.get_tpu_info().vmem_capacity_bytes)
    except Exception:
        cap = 64 * 1024 * 1024          # conservative: v7x per-TC capacity
    return (cap * 7) // 8               # leave headroom for the compiler


def fast_rcnn_predictor(x, fused, *, tile_n=512, out_dtype=jnp.float32):
    """x: (N, C) or (N, C, 1, 1). `fused` from prepare_params().
    Returns (scores, bbox_deltas, depth_deltas)."""
    if x.ndim == 4:
        assert x.shape[2] == 1 and x.shape[3] == 1
    x = x.reshape(x.shape[0], -1)
    n, c = x.shape
    assert c == fused["in_channels"]

    w_p, b_p = fused["w"], fused["b"]
    compute_dtype = w_p.dtype
    c_pad, out_pad = fused["c_pad"], fused["out_pad"]
    num_classes = fused["num_classes"]
    k4 = num_classes * 4

    # --- N tiling: keep >=2 grid steps when possible (v7x dual TensorCore) ---
    sub = 16 if compute_dtype == jnp.bfloat16 else 8
    tile = min(tile_n, _round_up(n, sub))
    if tile >= n and n > sub:
        tile = max(sub, _round_up(-(-n // 2), sub))
    n_pad = _round_up(n, tile)
    grid = (n_pad // tile,)

    # --- pad/cast x only when needed (common C%128==0, bf16 case is a no-op) ---
    x_c = x if x.dtype == compute_dtype else x.astype(compute_dtype)
    if n_pad != n or c_pad != c:
        x_c = jnp.pad(x_c, ((0, n_pad - n), (0, c_pad - c)))

    w_spec, b_spec, w_bufs = _resident_specs((c_pad, out_pad), (1, out_pad))

    in_it = jnp.dtype(compute_dtype).itemsize
    out_it = jnp.dtype(out_dtype).itemsize
    vmem_bytes = int(
        2 * tile * c_pad * in_it               # double-buffered x tiles
        + w_bufs * c_pad * out_pad * in_it     # resident fused weight
        + w_bufs * 8 * out_pad * 4             # bias (sublane-padded)
        + 2 * tile * out_pad * out_it          # double-buffered output tiles
        + (4 << 20))                           # compiler headroom
    vmem_bytes = min(max(vmem_bytes, 8 << 20), _vmem_ceiling())

    cost = pl.CostEstimate(
        flops=2 * n_pad * c_pad * out_pad,
        bytes_accessed=(n_pad * c_pad * in_it
                        + c_pad * out_pad * in_it
                        + out_pad * 4
                        + n_pad * out_pad * out_it),
        transcendentals=0)

    out = pl.pallas_call(
        _predictor_kernel,
        out_shape=jax.ShapeDtypeStruct((n_pad, out_pad), out_dtype),
        grid_spec=pltpu.PrefetchScalarGridSpec(
            num_scalar_prefetch=0,
            grid=grid,
            in_specs=[
                pl.BlockSpec((tile, c_pad), lambda i: (i, 0)),   # x tile
                w_spec,                                          # fused W (resident)
                b_spec,                                          # fused bias
            ],
            out_specs=pl.BlockSpec((tile, out_pad), lambda i: (i, 0)),
        ),
        compiler_params=pltpu.CompilerParams(
            dimension_semantics=("parallel",),
            vmem_limit_bytes=vmem_bytes),
        cost_estimate=cost,
    )(x_c, w_p, b_p)

    # Slice the heads straight from the padded slab (no intermediate copy).
    scores = out[:n, :num_classes]
    bbox = out[:n, num_classes:num_classes + k4]
    depth = out[:n, num_classes + k4:num_classes + 2 * k4]
    return scores, bbox, depth


def init_params(key, in_channels, num_classes):
    """Deterministic init matching the nn.Linear shapes (weights stored as
    (in_features, out_features), i.e. already transposed for x @ W)."""
    ks = jax.random.split(key, 6)

    def lin(kw, kb, fan_in, fan_out):
        bound = 1.0 / jnp.sqrt(fan_in)
        w = jax.random.uniform(kw, (fan_in, fan_out), jnp.float32, -bound, bound)
        b = jax.random.uniform(kb, (fan_out,), jnp.float32, -bound, bound)
        return w, b

    wc, bc = lin(ks[0], ks[1], in_channels, num_classes)
    wb, bb = lin(ks[2], ks[3], in_channels, num_classes * 4)
    wd, bd = lin(ks[4], ks[5], in_channels + num_classes, num_classes * 4)
    return {"wc": wc, "bc": bc, "wb": wb, "bb": bb, "wd": wd, "bd": bd}


def reference(x, params):
    if x.ndim == 4:
        x = x.reshape(x.shape[0], -1)
    scores = x @ params["wc"] + params["bc"]
    bbox = x @ params["wb"] + params["bb"]
    depth = jnp.concatenate([scores, x], axis=1) @ params["wd"] + params["bd"]
    return scores, bbox, depth


if __name__ == "__main__":
    key = jax.random.PRNGKey(0)
    k_x, k_p = jax.random.split(key)

    batch, in_channels, num_classes = 2, 32, 8
    # Same semantics as the 4-D NCHW path: (N, C, 1, 1) -> flatten -> (N, C)
    x = jax.random.normal(k_x, (batch, in_channels, 1, 1), jnp.float32)
    params = init_params(k_p, in_channels, num_classes)
    ref_s, ref_b, ref_d = reference(x, params)

    # --- f32 compute path: tight correctness check ---
    fused_f32 = prepare_params(params, compute_dtype=jnp.float32)
    s32, b32, d32 = fast_rcnn_predictor(x, fused_f32)
    jax.block_until_ready((s32, b32, d32))
    assert s32.shape == (batch, num_classes)
    assert b32.shape == (batch, num_classes * 4)
    assert d32.shape == (batch, num_classes * 4)
    # Depth head is algebraically folded (different FP summation order).
    assert jnp.allclose(s32, ref_s, atol=1e-4, rtol=1e-4)
    assert jnp.allclose(b32, ref_b, atol=1e-4, rtol=1e-4)
    assert jnp.allclose(d32, ref_d, atol=1e-4, rtol=1e-4)

    # --- default bf16 compute path (f32 accumulation): looser check ---
    fused_bf16 = prepare_params(params)          # compute_dtype=bfloat16
    s16, b16, d16 = fast_rcnn_predictor(x, fused_bf16)
    jax.block_until_ready((s16, b16, d16))
    assert s16.shape == (batch, num_classes)
    assert b16.shape == (batch, num_classes * 4)
    assert d16.shape == (batch, num_classes * 4)
    assert jnp.allclose(s16, ref_s, atol=5e-2, rtol=5e-2)
    assert jnp.allclose(b16, ref_b, atol=5e-2, rtol=5e-2)
    assert jnp.allclose(d16, ref_d, atol=5e-2, rtol=5e-2)

    print("KERNEL_OK")
</pallas_src>

<mosaic_0001>
module attributes {stable_mosaic.version = 11 : i64} {
  func.func @_predictor_kernel(%arg0: i32, %arg1: memref<8x128xf32, #tpu.memory_space<vmem>>, %arg2: memref<128x128xf32, #tpu.memory_space<vmem>>, %arg3: memref<1x128xf32, #tpu.memory_space<vmem>>, %arg4: memref<8x128xf32, #tpu.memory_space<vmem>>) attributes {dimension_semantics = [#tpu.dimension_semantics<parallel>], iteration_bounds = array<i64: 1>, scalar_prefetch = 0 : i64, scratch_operands = 0 : i64, tpu.core_type = #tpu.core_type<tc>, window_params = [{transform_indices = @transform_0, window_bounds = array<i64: 8, 128>}, {pipeline_mode = #tpu.pipeline_mode<synchronous>, transform_indices = @transform_1, window_bounds = array<i64: 128, 128>}, {pipeline_mode = #tpu.pipeline_mode<synchronous>, transform_indices = @transform_2, window_bounds = array<i64: 1, 128>}, {transform_indices = @transform_3, window_bounds = array<i64: 8, 128>}]} {
    %c0 = arith.constant 0 : index
    %c0_0 = arith.constant 0 : index
    %0 = vector.load %arg1[%c0, %c0_0] : memref<8x128xf32, #tpu.memory_space<vmem>>, vector<8x128xf32>
    %c0_1 = arith.constant 0 : index
    %c0_2 = arith.constant 0 : index
    %1 = vector.load %arg2[%c0_1, %c0_2] : memref<128x128xf32, #tpu.memory_space<vmem>>, vector<128x128xf32>
    %cst = arith.constant dense<0.000000e+00> : vector<8x128xf32>
    %2 = tpu.matmul %0, %1, %cst {dimension_numbers = #tpu.dot_dimension_numbers<[1], [0], [0], [1], [0, 0, 1, 1], [], []>} : vector<8x128xf32>, vector<128x128xf32>, vector<8x128xf32> -> vector<8x128xf32>
    %c0_3 = arith.constant 0 : index
    %c0_4 = arith.constant 0 : index
    %3 = vector.load %arg3[%c0_3, %c0_4] : memref<1x128xf32, #tpu.memory_space<vmem>>, vector<1x128xf32>
    %4 = vector.broadcast %3 : vector<1x128xf32> to vector<8x128xf32>
    %5 = arith.addf %2, %4 : vector<8x128xf32>
    %c0_5 = arith.constant 0 : index
    %c0_6 = arith.constant 0 : index
    %6 = vector.load %arg4[%c0_5, %c0_6] : memref<8x128xf32, #tpu.memory_space<vmem>>, vector<8x128xf32>
    tpu.vector_store %arg4[%c0_5, %c0_6], %5 {strides = array<i32>} : memref<8x128xf32, #tpu.memory_space<vmem>>, vector<8x128xf32>,
    return
  }
  func.func @transform_0(%arg0: i32) -> (i32, i32) {
    %c0_i32 = arith.constant 0 : i32
    %c0_i32_0 = arith.constant 0 : i32
    return %arg0, %c0_i32 : i32, i32
  }
  func.func @transform_1(%arg0: i32) -> (i32, i32) {
    %c0_i32 = arith.constant 0 : i32
    %c0_i32_0 = arith.constant 0 : i32
    %c0_i32_1 = arith.constant 0 : i32
    return %c0_i32, %c0_i32_0 : i32, i32
  }
  func.func @transform_2(%arg0: i32) -> (i32, i32) {
    %c0_i32 = arith.constant 0 : i32
    %c0_i32_0 = arith.constant 0 : i32
    %c0_i32_1 = arith.constant 0 : i32
    return %c0_i32, %c0_i32_0 : i32, i32
  }
  func.func @transform_3(%arg0: i32) -> (i32, i32) {
    %c0_i32 = arith.constant 0 : i32
    %c0_i32_0 = arith.constant 0 : i32
    return %arg0, %c0_i32 : i32, i32
  }
}

</mosaic_0001>

<bundles_post_ra>
// kernel: tpu_custom_call.1
= control target key start
LH: loop header
LB: loop body
LE: loop exit
PB: predicated region body
PF: predicated region fallthrough
CT: control target
= control target key end

     0   :  { %8 = vsyncpa [#allocation3], 0  ;;  %s226_s0 = inlined_call_operand.hbm [shape: f32[8,128], index: 0, kind: input, shape index: {}]   ;;  %s227_s1 = inlined_call_operand.hbm [shape: f32[128,128], index: 1, kind: input, shape index: {}]   ;;  %s228_s2 = inlined_call_operand.vmem [shape: f32[1,128], index: 2, kind: input, shape index: {}]   ;;  %s229_s3 = inlined_call_operand.hbm [shape: f32[8,128], index: 3, kind: output, shape index: {}]  }
   0x1   :  { %9 = vsyncpa [#allocation6], 0 }
   0x2   :  { %10 = vsyncpa [#allocation4], 0  ;;  %s16_s14 = sshll.u32 %s226_s0, 4  ;;  %s189_s15 = smov [#allocation2]   ;;  %s17_s14 = int_to_ptr.hbm [resolvable:$true] %s16_s14 }
   0x3   :  { %s18_s16 = sshll.u32 %s189_s15, 4  ;;  %s26_s19 = sshll.u32 %s227_s1, 4  ;;  %s19_s16 = int_to_ptr.vmem [resolvable:$true] %s18_s16  ;;  %s27_s19 = int_to_ptr.hbm [resolvable:$true] %s26_s19 }
   0x4   :  { %21 = dma.hbm_to_vmem [thread:$0]  %s17_s14, 128, %s19_s16, [#allocation3]  }
   0x5   :  { %s190_s20 = smov [#allocation5]   ;;  %s191_s22 = smov 128  }
   0x6   :  { %s28_s21 = sshll.u32 %s190_s20, 4  ;;  %s192_s23 = smov 8   ;;  %s29_s21 = int_to_ptr.vmem [resolvable:$true] %s28_s21 }
   0x7   :  { %34 = dma.hbm_to_vmem [thread:$0]  %s27_s19, 2048, %s29_s21, [#allocation6], %s191_s22, %s191_s22, %s192_s23  }
   0x8   :  { %183 = dma.done.wait [#allocation3], 128  }
   0x9   :  { %184 = vsyncadd [#allocation3], 4294967168 }
   0xa   :  { %185 = dma.done.wait [#allocation6], 2048  }
   0xb   :  { %186 = vsyncadd [#allocation6], 4294965248  ;;  %v61_v0 = vld [vmem:[#allocation5 + $0x78] sm:$0xff]  ;;  %v60_v1 = vld [vmem:[#allocation5 + $0x70] sm:$0xff]  ;;  %s193_s24 = smov [#allocation7]   ;;  %s94_s28 = sshll.u32 %s229_s3, 4  ;;  %s95_s28 = int_to_ptr.hbm [resolvable:$true] %s94_s28 }
   0xc   :  { %66 = vmatpush.msra.mxu0 %v61_v0  ;;  %v59_v2 = vld [vmem:[#allocation5 + $0x68] sm:$0xff]  ;;  %v58_v3 = vld [vmem:[#allocation5 + $0x60] sm:$0xff]  ;;  %v57_v4 = vld [vmem:[#allocation5 + $0x58] sm:$0xff]  ;;  %s92_s25 = sshll.u32 %s193_s24, 4  ;;  %s93_s25 = int_to_ptr.vmem [resolvable:$true] %s92_s25 }
   0xd   :  { %v56_v5 = vld [vmem:[#allocation5 + $0x50] sm:$0xff]  ;;  %v55_v6 = vld [vmem:[#allocation5 + $0x48] sm:$0xff]  ;;  %v54_v7 = vld [vmem:[#allocation5 + $0x40] sm:$0xff] }
   0xe   :  { %67 = vmatpush.msra.mxu0 %v60_v1  ;;  %v53_v8 = vld [vmem:[#allocation5 + $0x38] sm:$0xff]  ;;  %v52_v9 = vld [vmem:[#allocation5 + $0x30] sm:$0xff]  ;;  %v51_v10 = vld [vmem:[#allocation5 + $0x28] sm:$0xff] }
   0xf   :  { %v50_v11 = vld [vmem:[#allocation5 + $0x20] sm:$0xff]  ;;  %v49_v12 = vld [vmem:[#allocation5 + $0x18] sm:$0xff]  ;;  %v48_v13 = vld [vmem:[#allocation5 + $0x10] sm:$0xff] }
  0x10   :  { %68 = vmatpush.msra.mxu0 %v59_v2  ;;  %v47_v14 = vld [vmem:[#allocation5 + $0x8] sm:$0xff]  ;;  %v46_v15 = vld [vmem:[#allocation5] sm:$0xff]  ;;  %v45_v16 = vld [vmem:[#allocation2] sm:$0xff] }
  0x11   :  { %v110_v17 = vld [vmem:[%s228_s2] ss:$0 sm:$0xff] }
  0x12   :  { %69 = vmatpush.msra.mxu0 %v58_v3 }
  0x14   :  { %70 = vmatpush.msra.mxu0 %v57_v4 }
  0x16   :  { %71 = vmatpush.msra.mxu0 %v56_v5 }
  0x18   :  { %72 = vmatpush.msra.mxu0 %v55_v6 }
  0x1a   :  { %73 = vmatpush.msra.mxu0 %v54_v7 }
  0x1c   :  { %74 = vmatpush.msra.mxu0 %v53_v8 }
  0x1e   :  { %75 = vmatpush.msra.mxu0 %v52_v9 }
  0x20   :  { %76 = vmatpush.msra.mxu0 %v51_v10 }
  0x22   :  { %77 = vmatpush.msra.mxu0 %v50_v11 }
  0x24   :  { %78 = vmatpush.msra.mxu0 %v49_v12 }
  0x26   :  { %79 = vmatpush.msra.mxu0 %v48_v13 }
  0x28   :  { %80 = vmatpush.msra.mxu0 %v47_v14 }
  0x2a   :  { %81 = vmatpush.msra.mxu0 %v46_v15 }
  0x2b   :  { %82 = vmatmul.f32.vlgmr.msra.gmra.mxu0 %v45_v16 }
  0xa8   :  { %v83_v18 = vpop.f32.mrf.mxu0 }
  0xa9   :  { %v84_v19 = vadd.f32 %v110_v17, %v83_v18 }
  0xab   :  { %86 = vst [vmem:[#allocation7] sm:$0xff] %v84_v19 }
  0xac   :  { %97 = dma.vmem_to_hbm [thread:$0]  %s93_s25, 128, %s95_s28, [#allocation4]  }
  0xad   :  { %187 = dma.done.wait [#allocation4], 128  }
  0xae   :  { %188 = vsyncadd [#allocation4], 4294967168 }
  0xaf   :  { %102 = vsyncpa [#allocation3], 1 }
  0xb0   :  { %103 = vsyncpa [#allocation6], 1 }
  0xb1   :  { %104 = vsyncpa [#allocation4], 1 }

</bundles_post_ra>
